<compile_context>
chip_gen: v5e
topology: v5e:2x2
jax: 0.10.0
libtpu: 0.0.40
codegen_flags: <defaults>
</compile_context>

<pallas_src>
import numpy as np
import jax
import jax.numpy as jnp
from jax.experimental import pallas as pl
from jax.experimental.pallas import tpu as pltpu


def make_pe_vals(T, D, dtype=jnp.float32):
    """Deterministic parameter init, exactly mirroring PE.__init__."""
    pos = jnp.arange(0, T, 1, dtype=jnp.float32)
    pos_vals = jnp.log(pos + 1e-05).reshape(-1, 1)                       # (T, 1)
    pos_vals = jnp.tile(pos_vals, (1, D))                                # (T, D)

    d_idx = jnp.arange(0, D, 1)
    D_vals = ((d_idx // 2).astype(jnp.float32) * 2.0 / D *
              jnp.log(jnp.asarray(10000.0, dtype=jnp.float32))).reshape(1, -1)
    D_vals = jnp.tile(D_vals, (T, 1))                                    # (T, D)

    add_pi = ((d_idx % 2).astype(jnp.float32) * np.pi / 2.0).reshape(1, -1)

    vals = jnp.exp(pos_vals - D_vals) + add_pi                           # (T, D)
    return jnp.sin(vals).astype(dtype)                                   # (T, D)


def pe_add_kernel(x_ref, pe_ref, o_ref):
    # Tiled path:   x_ref (1, tT, D), pe_ref (1, tT, D) -> pure elementwise add.
    # Single-shot:  x_ref (B, T, D),  pe_ref (1, T, D)  -> broadcast over batch once.
    o_ref[...] = x_ref[...] + pe_ref[...]


def _sublane_multiple(dtype):
    itemsize = jnp.dtype(dtype).itemsize
    return {4: 8, 2: 16, 1: 32}.get(itemsize, 8)


def _pick_tile(T, cap_rows, sub):
    """Largest tile <= cap_rows that (a) is a multiple of the sublane count and
    (b) divides T exactly (uniform, unmasked tiles).  Falls back to a
    sublane-rounded value (ragged last tile, Pallas masks it) if no divisor."""
    cap_rows = min(cap_rows, T)
    if cap_rows >= T:
        return T  # full-extent block: always legal regardless of divisibility
    t = max(sub, (cap_rows // sub) * sub)
    cand = t
    while cand >= sub:
        if T % cand == 0:
            return cand
        cand -= sub
    return t  # no sublane-multiple divisor of T under the cap -> ragged tail


def pe_forward(x, pe_vals, *, vmem_budget_bytes=24 * 1024 * 1024):
    """out = x + pe_vals[:T, :D], broadcast over batch (matches PE.forward)."""
    B, T, D = x.shape
    itemsize = jnp.dtype(x.dtype).itemsize

    # Skip the slice/cast pass entirely when the table is already exact.
    if pe_vals.shape != (T, D) or pe_vals.dtype != x.dtype:
        pe = pe_vals[:T, :D].astype(x.dtype)
    else:
        pe = pe_vals
    pe = pe.reshape(1, T, D)

    # --- tiny-shape fast path: one gridless invocation, whole arrays in VMEM ---
    single_shot_bytes = (2 * B * T * D + T * D) * itemsize  # x + out + pe
    if single_shot_bytes <= 4 * 1024 * 1024:
        return pl.pallas_call(
            pe_add_kernel,
            out_shape=jax.ShapeDtypeStruct((B, T, D), x.dtype),
            input_output_aliases={0: 0},
        )(x, pe)

    # --- tiled path: lane-dense (full-D) blocks, seq tiles outer / batch inner ---
    sub = _sublane_multiple(x.dtype)
    # ~6 pipelined buffers live at once: 2x x-block, 2x out-block, 2x pe-block.
    cap_rows = max(sub, vmem_budget_bytes // (6 * D * itemsize))
    tT = _pick_tile(T, cap_rows, sub)
    nT = pl.cdiv(T, tT)

    block_bytes = tT * D * itemsize
    vmem_limit = int(min(48 * 1024 * 1024,
                         max(32 * 1024 * 1024, 6 * block_bytes + (8 << 20))))

    if nT >= 2:
        # Seq tiles outermost, batch innermost: pe block index is constant across
        # the inner b loop -> Pallas skips re-fetching pe (HBM pe traffic /B).
        grid = (nT, B)
        x_spec = pl.BlockSpec((1, tT, D), lambda t, b: (b, t, 0))
        pe_spec = pl.BlockSpec((1, tT, D), lambda t, b: (0, t, 0))
        out_spec = pl.BlockSpec((1, tT, D), lambda t, b: (b, t, 0))
    else:
        # Whole T fits in one tile: put B outermost so the leading parallel axis
        # still has >= 2 tiles (v7x megacore).  pe index stays constant -> 1 fetch.
        grid = (B, nT)
        x_spec = pl.BlockSpec((1, tT, D), lambda b, t: (b, t, 0))
        pe_spec = pl.BlockSpec((1, tT, D), lambda b, t: (0, t, 0))
        out_spec = pl.BlockSpec((1, tT, D), lambda b, t: (b, t, 0))

    return pl.pallas_call(
        pe_add_kernel,
        out_shape=jax.ShapeDtypeStruct((B, T, D), x.dtype),
        grid=grid,
        in_specs=[x_spec, pe_spec],
        out_specs=out_spec,
        input_output_aliases={0: 0},
        compiler_params=pltpu.CompilerParams(
            dimension_semantics=("parallel", "parallel"),
            vmem_limit_bytes=vmem_limit),
    )(x, pe)


# Donate x so XLA honors the input/output alias without a defensive copy.
pe_forward_jit = jax.jit(pe_forward, donate_argnums=(0,),
                         static_argnames=("vmem_budget_bytes",))


if __name__ == "__main__":
    key = jax.random.PRNGKey(0)
    k1, k2 = jax.random.split(key)

    # --- small test, consistent with the module's (B, T, D) forward ---
    # PE table built for T_max >= T; module slices [:T, :D] -> wrapper slice path.
    B, T, D = 2, 8, 32
    T_max = 16
    x_small = jax.random.normal(k1, (B, T, D), dtype=jnp.float32)
    pe_small = make_pe_vals(T_max, D)

    ref_small = x_small + pe_small[:T, :D][None, :, :]
    out_small = jax.block_until_ready(pe_forward_jit(x_small, pe_small))
    np.testing.assert_allclose(np.asarray(out_small), np.asarray(ref_small),
                               rtol=1e-6, atol=1e-6)

    # --- medium test exercising the tiled (seq-outer, batch-inner) path ---
    # Exact-size, exact-dtype PE table -> no slice/cast pass in the wrapper.
    B2, T2, D2 = 2, 2048, 256
    x_med = jax.random.normal(k2, (B2, T2, D2), dtype=jnp.float32)
    pe_med = make_pe_vals(T2, D2)

    ref_med = x_med + pe_med[None, :, :]
    # Small VMEM budget here just to force multiple seq tiles on the toy shape.
    out_med = jax.block_until_ready(
        pe_forward_jit(x_med, pe_med, vmem_budget_bytes=2 * 1024 * 1024))
    np.testing.assert_allclose(np.asarray(out_med), np.asarray(ref_med),
                               rtol=1e-6, atol=1e-6)

    print("KERNEL_OK")
</pallas_src>

<mosaic_0001>
module attributes {stable_mosaic.version = 11 : i64} {
  func.func @pe_add_kernel(%arg0: memref<2x8x32xf32, #tpu.memory_space<vmem>>, %arg1: memref<1x8x32xf32, #tpu.memory_space<vmem>>, %arg2: memref<2x8x32xf32, #tpu.memory_space<vmem>>) attributes {dimension_semantics = [], scalar_prefetch = 0 : i64, scratch_operands = 0 : i64, tpu.core_type = #tpu.core_type<tc>} {
    %c0 = arith.constant 0 : index
    %c0_0 = arith.constant 0 : index
    %c0_1 = arith.constant 0 : index
    %0 = vector.load %arg0[%c0, %c0_0, %c0_1] : memref<2x8x32xf32, #tpu.memory_space<vmem>>, vector<2x8x32xf32>
    %c0_2 = arith.constant 0 : index
    %c0_3 = arith.constant 0 : index
    %c0_4 = arith.constant 0 : index
    %1 = vector.load %arg1[%c0_2, %c0_3, %c0_4] : memref<1x8x32xf32, #tpu.memory_space<vmem>>, vector<1x8x32xf32>
    %2 = vector.broadcast %1 : vector<1x8x32xf32> to vector<2x8x32xf32>
    %3 = arith.addf %0, %2 : vector<2x8x32xf32>
    %c0_5 = arith.constant 0 : index
    %c0_6 = arith.constant 0 : index
    %c0_7 = arith.constant 0 : index
    %4 = vector.load %arg2[%c0_5, %c0_6, %c0_7] : memref<2x8x32xf32, #tpu.memory_space<vmem>>, vector<2x8x32xf32>
    tpu.vector_store %arg2[%c0_5, %c0_6, %c0_7], %3 {strides = array<i32>} : memref<2x8x32xf32, #tpu.memory_space<vmem>>, vector<2x8x32xf32>,
    return
  }
}

</mosaic_0001>

<bundles_post_ra>
// kernel: pe_forward.1
= control target key start
LH: loop header
LB: loop body
LE: loop exit
PB: predicated region body
PF: predicated region fallthrough
CT: control target
= control target key end

     0   :  { %7 = vsyncpa [#allocation3], 0  ;;  %s139_s0 = inlined_call_operand.hbm [shape: f32[2,8,32], index: 0, kind: input, shape index: {}, may-alias: {0,2}]   ;;  %s140_s1 = inlined_call_operand.vmem [shape: f32[1,8,32], index: 1, kind: input, shape index: {}]   ;;  %s141_s2 = inlined_call_operand.hbm [shape: f32[2,8,32], index: 2, kind: output, shape index: {}, may-alias: {0,2}]  }
   0x1   :  { %8 = vsyncpa [#allocation4], 0  ;;  %s13_s11 = sshll.u32 %s139_s0, 4  ;;  %s111_s12 = smov [#allocation2]   ;;  %s14_s11 = int_to_ptr.hbm [resolvable:$true] %s13_s11 }
   0x2   :  { %s15_s13 = sshll.u32 %s111_s12, 4  ;;  %s112_s14 = smov 128   ;;  %s16_s13 = int_to_ptr.vmem [resolvable:$true] %s15_s13 }
   0x3   :  { %s113_s15 = smov 8  }
   0x4   :  { %21 = dma.hbm_to_vmem [thread:$0]  %s14_s11, 256, %s16_s13, [#allocation3], %s112_s14, %s112_s14, %s113_s15  }
   0x5   :  { %107 = dma.done.wait [#allocation3], 256  }
   0x6   :  { %108 = vsyncadd [#allocation3], 4294967040  ;;  %s114_s16 = smov [#allocation5]   ;;  %s42_s20 = sshll.u32 %s141_s2, 4  ;;  %v28_v0 = vld [vmem:[#allocation2] sm:$0xff]  ;;  %vm33_vm0 = vcmask 261120   ;;  %s43_s20 = int_to_ptr.hbm [resolvable:$true] %s42_s20 }
   0x7   :  { %s40_s17 = sshll.u32 %s114_s16, 4  ;;  %v30_v1 = vld [vmem:[%s140_s1] sm:$0xff]  ;;  %v29_v2 = vld [vmem:[#allocation2 + $0x8] sm:$0xff]  ;;  %s41_s17 = int_to_ptr.vmem [resolvable:$true] %s40_s17 }
   0x8   :  { %v31_v3 = vadd.f32 %v30_v1, %v28_v0  ;;  %v32_v4 = vadd.f32 %v30_v1, %v29_v2 }
   0xa   :  { %34 = vst.msk [vmem:[#allocation5] sm:$0xff] %vm33_vm0, %v31_v3 }
   0xb   :  { %35 = vst.msk [vmem:[#allocation5 + $0x8] sm:$0xff] %vm33_vm0, %v32_v4 }
   0xc   :  { %48 = dma.vmem_to_hbm [thread:$0]  %s41_s17, 256, %s43_s20, [#allocation4], %s112_s14, %s112_s14, %s113_s15  }
   0xd   :  { %109 = dma.done.wait [#allocation4], 256  }
   0xe   :  { %110 = vsyncadd [#allocation4], 4294967040 }
   0xf   :  { %53 = vsyncpa [#allocation3], 1 }
  0x10   :  { %54 = vsyncpa [#allocation4], 1 }

</bundles_post_ra>
